<compile_context>
chip_gen: v6e
topology: v6e:2x2x1
jax: 0.10.0
libtpu: 0.0.40
codegen_flags: <defaults>
</compile_context>

<pallas_src>
import jax
import jax.numpy as jnp
from jax.experimental import pallas as pl
from jax.experimental.pallas import tpu as pltpu


def build_sinusoidal_pe(dim, max_tokens=5000, dtype=jnp.float32):
    """Same table as the torch module __init__; shape (1, max_tokens, dim)."""
    position = jnp.arange(max_tokens, dtype=jnp.float32)[:, None]            # (T, 1)
    div_term = jnp.exp(jnp.arange(0, dim, 2, dtype=jnp.float32)
                       * (-jnp.log(10000.0) / dim))                          # (dim/2,)
    ang = position * div_term                                                # (T, dim/2)
    pe = jnp.zeros((max_tokens, dim), dtype=jnp.float32)
    pe = pe.at[:, 0::2].set(jnp.sin(ang))
    pe = pe.at[:, 1::2].set(jnp.cos(ang))
    return pe[None].astype(dtype)                                            # (1, T, dim)


def _add_pe_rows_kernel(x_ref, pe_ref, o_ref):
    # x_ref / pe_ref / o_ref: (tile_rows, D)
    o_ref[...] = x_ref[...] + pe_ref[...]


def _add_pe_batched_kernel(x_ref, pe_ref, o_ref):
    # x_ref / o_ref: (1, S, D); pe_ref: (S, D)
    o_ref[0] = x_ref[0] + pe_ref[...]


def _row_tile(seq, max_rows=512):
    """Largest multiple of 8 that divides seq, capped at max_rows (None if none)."""
    best = None
    t = 8
    while t <= min(seq, max_rows):
        if seq % t == 0:
            best = t
        t += 8
    return best


def positional_encoding_sin_pallas(x, pe):
    """
    x  : (B, S, D)
    pe : (1, max_tokens, D) sinusoidal table (module buffer), max_tokens >= S
    returns x + pe[:, :S, :]
    """
    # TODO(synk): nn.Dropout is identity here (eval mode); training-mode dropout
    # (random mask + 1/(1-p) scale) is omitted.
    B, S, D = x.shape
    pe_s = pe[0, :S, :].astype(x.dtype)                                      # (S, D)

    tile = _row_tile(S)
    if tile is not None:
        rows = B * S
        x2 = x.reshape(rows, D)                                              # fold batch into rows
        n_pe_blocks = S // tile
        if n_pe_blocks == 1:
            pe_index = lambda t: (0, 0)                                      # grid-invariant block
        else:
            pe_index = lambda t: (t % n_pe_blocks, 0)                        # position within batch
        out = pl.pallas_call(
            _add_pe_rows_kernel,
            out_shape=jax.ShapeDtypeStruct((rows, D), x.dtype),
            grid=(rows // tile,),
            in_specs=[
                pl.BlockSpec((tile, D), lambda t: (t, 0)),
                pl.BlockSpec((tile, D), pe_index),
            ],
            out_specs=pl.BlockSpec((tile, D), lambda t: (t, 0)),
            compiler_params=pltpu.CompilerParams(
                dimension_semantics=("parallel",)),
        )(x2, pe_s)
        return out.reshape(B, S, D)

    # Fallback (S not a multiple of 8): one batch element per grid step with full
    # (S, D) blocks — full-array dims satisfy the (8,128)-or-full rule.
    return pl.pallas_call(
        _add_pe_batched_kernel,
        out_shape=jax.ShapeDtypeStruct((B, S, D), x.dtype),
        grid=(B,),
        in_specs=[
            pl.BlockSpec((1, S, D), lambda b: (b, 0, 0)),
            pl.BlockSpec((S, D), lambda b: (0, 0)),
        ],
        out_specs=pl.BlockSpec((1, S, D), lambda b: (b, 0, 0)),
        compiler_params=pltpu.CompilerParams(
            dimension_semantics=("parallel",)),
    )(x, pe_s)


if __name__ == "__main__":
    # Shapes implied by the module forward: x = (batch, seq_tokens, dim)
    B, S, D = 2, 8, 32
    key = jax.random.PRNGKey(0)
    x = jax.random.normal(key, (B, S, D), dtype=jnp.float32)
    pe = build_sinusoidal_pe(D, max_tokens=5000)

    out = positional_encoding_sin_pallas(x, pe)
    out = jax.block_until_ready(out)

    # Pure-JAX reference.
    ref = x + pe[:, :S, :]
    assert out.shape == (B, S, D)
    assert jnp.allclose(out, ref, atol=1e-6, rtol=1e-6)

    print("KERNEL_OK")
</pallas_src>

<mosaic_0001>
module attributes {stable_mosaic.version = 11 : i64} {
  func.func @_add_pe_rows_kernel(%arg0: i32, %arg1: memref<8x32xf32, #tpu.memory_space<vmem>>, %arg2: memref<8x32xf32, #tpu.memory_space<vmem>>, %arg3: memref<8x32xf32, #tpu.memory_space<vmem>>) attributes {dimension_semantics = [#tpu.dimension_semantics<parallel>], iteration_bounds = array<i64: 2>, scalar_prefetch = 0 : i64, scratch_operands = 0 : i64, tpu.core_type = #tpu.core_type<tc>, window_params = [{transform_indices = @transform_0, window_bounds = array<i64: 8, 32>}, {pipeline_mode = #tpu.pipeline_mode<synchronous>, transform_indices = @transform_1, window_bounds = array<i64: 8, 32>}, {transform_indices = @transform_2, window_bounds = array<i64: 8, 32>}]} {
    %c0 = arith.constant 0 : index
    %c0_0 = arith.constant 0 : index
    %0 = vector.load %arg1[%c0, %c0_0] : memref<8x32xf32, #tpu.memory_space<vmem>>, vector<8x32xf32>
    %c0_1 = arith.constant 0 : index
    %c0_2 = arith.constant 0 : index
    %1 = vector.load %arg2[%c0_1, %c0_2] : memref<8x32xf32, #tpu.memory_space<vmem>>, vector<8x32xf32>
    %2 = arith.addf %0, %1 : vector<8x32xf32>
    %c0_3 = arith.constant 0 : index
    %c0_4 = arith.constant 0 : index
    %3 = vector.load %arg3[%c0_3, %c0_4] : memref<8x32xf32, #tpu.memory_space<vmem>>, vector<8x32xf32>
    tpu.vector_store %arg3[%c0_3, %c0_4], %2 {strides = array<i32>} : memref<8x32xf32, #tpu.memory_space<vmem>>, vector<8x32xf32>,
    return
  }
  func.func @transform_0(%arg0: i32) -> (i32, i32) {
    %c0_i32 = arith.constant 0 : i32
    %c0_i32_0 = arith.constant 0 : i32
    return %arg0, %c0_i32 : i32, i32
  }
  func.func @transform_1(%arg0: i32) -> (i32, i32) {
    %c0_i32 = arith.constant 0 : i32
    %c0_i32_0 = arith.constant 0 : i32
    %c0_i32_1 = arith.constant 0 : i32
    return %c0_i32, %c0_i32_0 : i32, i32
  }
  func.func @transform_2(%arg0: i32) -> (i32, i32) {
    %c0_i32 = arith.constant 0 : i32
    %c0_i32_0 = arith.constant 0 : i32
    return %arg0, %c0_i32 : i32, i32
  }
}

</mosaic_0001>

<bundles_post_ra>
// kernel: tpu_custom_call.1
= control target key start
LH: loop header
LB: loop body
LE: loop exit
PB: predicated region body
PF: predicated region fallthrough
CT: control target
= control target key end

     0   :  { %7 = vsyncpa [#allocation3], 0  ;;  %s650_s0 = inlined_call_operand.hbm [shape: f32[16,32], index: 0, kind: input, shape index: {}]   ;;  %s651_s1 = inlined_call_operand.hbm [shape: f32[8,32], index: 1, kind: input, shape index: {}]   ;;  %s652_s2 = inlined_call_operand.hbm [shape: f32[16,32], index: 2, kind: output, shape index: {}]  }
   0x1   :  { %9 = vsyncpa [#allocation3 + $0x1], 0 }
   0x2   :  { %10 = vsyncpa [#allocation6], 0 }
   0x3   :  { %11 = vsyncpa [#allocation4], 0 }
   0x4   :  { %13 = vsyncpa [#allocation4 + $0x1], 0  ;;  %s484_s9 = smov 0   ;;  %s486_s10 = smov 0  }
   0x5   :  { %s488_s11 = smov 0   ;;  %s490_s12 = smov 0  }
   0x6 LB: > { %s505_s13 = sadd.s32 4294967295, %s464_s12   ;;  %s271_s14 = sadd.s32 4294967294, %s464_s12   ;;  %s464_s12 = sphi %s490_s12, %s675_s12   ;;  %s460_s11 = sphi %s488_s11, %s674_s11   ;;  %s456_s10 = sphi %s486_s10, %s673_s10   ;;  %s452_s9 = sphi %s484_s9, %s672_s9  }
   0x7   : > { %p39_p0 = scmp.ne.s32.totalorder %s456_s10, %s452_s9  ;;  %p653_p1 = scmp.eq.s32.totalorder %s505_s13, 0 }
   0x8   : > { %p90_p3 = scmp.eq.s32.totalorder %s271_s14, 1  ;;  %p272_p5 = scmp.ge.s32.totalorder %s464_s12, 1 }
   0x9   : > { %p514_p4 = por %p653_p1, %p39_p0  ;;  %p97_p7 = scmp.lt.s32.totalorder %s464_s12, 3 }
   0xa   : > { %p519_p6 = por %p90_p3, %p39_p0  ;;  %s466_s18 = smov [#allocation5]  }
   0xb   : > { %s657_s15 = scalar_select %p514_p4, 1, 0 }
   0xc   : > { %s658_s16 = scalar_select %p519_p6, 1, 0 }
   0xd   : > { %p524_p8 = pnand %p272_p5, %p97_p7  ;;  %s110_s19 = sshll.u32 %s466_s18, 4  ;;  %s111_s19 = int_to_ptr.vmem [resolvable:$true] %s110_s19 }
   0xe   : > { %s532_s20 = sadd.s32 1, %s464_s12   ;;  %s26_s24 = sadd.s32 1, %s460_s11 }
   0xf   : > { %s659_s17 = scalar_select %p524_p8, 1, 0 }
  0x10   : > { %p293_p10 = pneg %p524_p8  ;;  %s23_s22 = ssub.s32 %s464_s12, %s532_s20 }
  0x11   : > { %p542_p12 = scmp.eq.s32.totalorder %s23_s22, 0  ;;  %p33_p13 = scmp.ne.s32.totalorder %s460_s11, %s456_s10 }
  0x12   : > { %p536_p11 = pnand %p293_p10, %p653_p1  ;;  %s353_s25 = scalar_lea.vmem %s111_s19, 128 }
  0x13   : > { %p354_p3 = scmp.ne.s32.totalorder %s111_s19, %s353_s25  ;;  %p361_p9 = scmp.lt.s32.totalorder %s111_s19, %s111_s19 }
  0x14   : > { %p344_p0 = pneg %p536_p11  ;;  %p362_p2 = scmp.lt.s32.totalorder %s353_s25, %s353_s25 }
  0x16   : > { %p356_p5 = pnand %p354_p3, %p344_p0  ;;  %p363_p10 = por %p362_p2, %p361_p9 }
  0x18   : > { %p357_p7 = pneg %p356_p5 }
  0x1a   : > { %p364_p1 = pnand %p363_p10, %p357_p7 }
  0x1c   : > { %367 = shalt.err (!%p364_p1)
}
  0x1d   : > { %296 = dma.hbm_to_vmem [thread:$0]  (!%p536_p11), %s651_s1, 128, %s111_s19, [#allocation6]  }
  0x1e   : > { %s559_s28 = scalar_select %p542_p12, %s460_s11, %s26_s24  }
  0x1f   : > { %p34_p1 = scmp.eq.s32.totalorder %s464_s12, 0  ;;  %p662_p2 = scmp.eq.s32.totalorder %s505_s13, 1 }
  0x20   : > { %p306_p0 = scmp.lt.s32.totalorder %s464_s12, 2  ;;  %s121_s30 = sand.u32 1, %s460_s11  }
  0x21   : > { %p567_p9 = por %p662_p2, %p33_p13  ;;  %p35_p3 = por %p34_p1, %p33_p13 }
  0x22   : > { %s275_s3 = sshll.u32 %s121_s30, 3  ;;  %s276_s4 = sshll.u32 %s464_s12, 7 }
  0x23   : > { %s663_s29 = scalar_select %p567_p9, 1, 0 }
  0x24   : > { %s580_s7 = scalar_lea.hbm %s650_s0, %s276_s4  ;;  %s125_s8 = scalar_lea.vmem [#allocation2], %s275_s3 }
  0x25   : > { %s132_s14 = sshll.u32 %s125_s8, 4  ;;  %p582_p11 = pnand %p306_p0, %p35_p3  ;;  %s133_s14 = int_to_ptr.vmem [resolvable:$true] %s132_s14 }
  0x26   : > { %s122_s19 = scalar_lea.sflag [#allocation3], %s121_s30  ;;  %s368_s21 = scalar_lea.hbm %s580_s7, 128 }
  0x27   : > { %p369_p12 = scmp.ne.s32.totalorder %s580_s7, %s368_s21  ;;  %p370_p13 = pneg %p582_p11 }
  0x28   : > { %s373_s24 = scalar_lea.hbm %s650_s0, 256  ;;  %p374_p10 = scmp.lt.s32.totalorder %s580_s7, %s650_s0 }
  0x29   : > { %p371_p5 = pnand %p370_p13, %p369_p12  ;;  %p375_p1 = scmp.lt.s32.totalorder %s373_s24, %s368_s21 }
  0x2b   : > { %p372_p7 = pneg %p371_p5  ;;  %p376_p2 = por %p375_p1, %p374_p10 }
  0x2d   : > { %p377_p0 = pnand %p376_p2, %p372_p7 }
  0x2f   : > { %380 = shalt.err (!%p377_p0)
}
  0x30   : > { %s381_s27 = scalar_lea.vmem %s133_s14, 128  ;;  %s467_s30 = smov [#allocation2]  }
  0x31   : > { %p382_p3 = scmp.ne.s32.totalorder %s133_s14, %s381_s27  ;;  %s386_s3 = sshll.u32 %s467_s30, 4  ;;  %s387_s3 = int_to_ptr.vmem [resolvable:$false] %s386_s3 }
  0x32   : > { %s388_s4 = scalar_lea.vmem %s387_s3, 256  ;;  %p389_p12 = scmp.lt.s32.totalorder %s133_s14, %s387_s3 }
  0x33   : > { %p384_p6 = pnand %p382_p3, %p370_p13  ;;  %p390_p5 = scmp.lt.s32.totalorder %s388_s4, %s381_s27 }
  0x35   : > { %p385_p9 = pneg %p384_p6  ;;  %p391_p4 = por %p390_p5, %p389_p12 }
  0x37   : > { %p392_p8 = pnand %p391_p4, %p385_p9 }
  0x39   : > { %395 = shalt.err (!%p392_p8)
}
  0x3a   : > { %300 = dma.hbm_to_vmem [thread:$0]  (!%p582_p11), %s580_s7, 128, %s133_s14, %s122_s19  }
  0x3b   : > { %p665_p7 = scmp.ne.s32.totalorder %s659_s17, 0 }
  0x3c   : > { %s603_s5 = sand.u32 (!%p665_p7), 1, %s456_s10   ;;  %p666_p6 = scmp.ne.s32.totalorder (!%p665_p7), %s657_s15, 0 }
  0x3d   : > { %141 = sbr.rel (%p665_p7) target bundleno = 95 (0x5f), region = 28  ;;  %s278_s6 = sshll.u32 (!%p665_p7), %s603_s5, 3 }
  0x3e   : > { %s144_s8 = scalar_lea.sflag (!%p665_p7), [#allocation3], %s603_s5  ;;  %s147_s21 = scalar_lea.vmem (!%p665_p7), [#allocation2], %s278_s6 }
  0x42   : > { %439 = dma.done.wait (%p666_p6), %s144_s8, 128  }
  0x43   : > { %441 = vsyncadd (%p666_p6), %s144_s8, 4294967168  ;;  %p667_p4 = scmp.eq.s32.totalorder %s505_s13, 0 }
  0x45   : > { %443 = dma.done.wait (%p667_p4), [#allocation6], 128   ;;  %p668_p8 = pmov %p667_p4 }
  0x46   : > { %s171_s17 = scalar_lea.vmem [#allocation7], %s278_s6  ;;  %s282_s14 = sshll.u32 %s505_s13, 7  ;;  %v172_v0 = vld [vmem:[%s147_s21] sm:$0xff]  ;;  %v173_v1 = vld [vmem:[#allocation5] sm:$0xff]  ;;  %vm175_vm0 = vcmask 261120  }
  0x47   : > { %445 = vsyncadd (%p668_p8), [#allocation6], 4294967168  ;;  %s191_s7 = sshll.u32 %s171_s17, 4  ;;  %v174_v2 = vadd.f32 %v173_v1, %v172_v0  ;;  %s189_s19 = scalar_lea.hbm %s652_s2, %s282_s14  ;;  %s192_s7 = int_to_ptr.vmem [resolvable:$true] %s191_s7 }
  0x48   : > { %s178_s22 = scalar_lea.sflag [#allocation4], %s603_s5  ;;  %s396_s23 = scalar_lea.vmem %s192_s7, 128 }
  0x49   : > { %176 = vst.msk [vmem:[%s171_s17] sm:$0xff] %vm175_vm0, %v174_v2  ;;  %p397_p9 = scmp.ne.s32.totalorder %s192_s7, %s396_s23  ;;  %p669_p11 = scmp.ne.s32.totalorder %s663_s29, 0 }
  0x4a   : > { %s468_s24 = smov [#allocation7]  }
  0x4b   : > { %p398_p13 = pnand %p397_p9, %p669_p11  ;;  %s400_s25 = sshll.u32 %s468_s24, 4  ;;  %s401_s25 = int_to_ptr.vmem [resolvable:$false] %s400_s25 }
  0x4c   : > { %s402_s13 = scalar_lea.vmem %s401_s25, 256  ;;  %p403_p1 = scmp.lt.s32.totalorder %s192_s7, %s401_s25 }
  0x4d   : > { %p399_p10 = pneg %p398_p13  ;;  %p404_p2 = scmp.lt.s32.totalorder %s402_s13, %s396_s23 }
  0x4f   : > { %p405_p0 = por %p404_p2, %p403_p1 }
  0x51   : > { %p406_p3 = pnand %p405_p0, %p399_p10 }
  0x53   : > { %409 = shalt.err (!%p406_p3)
}
  0x54   : > { %s410_s26 = scalar_lea.hbm %s189_s19, 128  ;;  %s414_s3 = scalar_lea.hbm %s652_s2, 256 }
  0x55   : > { %p411_p12 = scmp.ne.s32.totalorder %s189_s19, %s410_s26  ;;  %p415_p6 = scmp.lt.s32.totalorder %s189_s19, %s652_s2 }
  0x56   : > { %p416_p4 = scmp.lt.s32.totalorder %s414_s3, %s410_s26 }
  0x57   : > { %p412_p5 = pnand %p411_p12, %p669_p11 }
  0x58   : > { %p417_p8 = por %p416_p4, %p415_p6 }
  0x59   : > { %p413_p7 = pneg %p412_p5 }
  0x5b   : > { %p418_p9 = pnand %p417_p8, %p413_p7 }
  0x5d   : > { %421 = shalt.err (!%p418_p9)
}
  0x5e   : > { %291 = dma.vmem_to_hbm [thread:$0]  (%p669_p11), %s192_s7, 128, %s189_s19, %s178_s22  }
  0x5f PF: > { %s203_s6 = sand.u32 1, %s452_s9   ;;  %p670_p13 = scmp.ne.s32.totalorder %s658_s16, 0 }
  0x60   : > { %p671_p10 = scmp.ge.s32.totalorder %s464_s12, 2  ;;  %s204_s8 = scalar_lea.sflag [#allocation4], %s203_s6 }
  0x62   : > { %p302_p1 = pnand %p671_p10, %p670_p13 }
  0x64   : > { %p303_p2 = pneg %p302_p1 }
  0x66   : > { %447 = dma.done.wait (%p303_p2), %s204_s8, 128  }
  0x67   : > { %449 = vsyncadd (%p303_p2), %s204_s8, 4294967168  ;;  %p16_p0 = scmp.ge.s32.totalorder %s532_s20, 4   ;;  %s672_s9 = smov %s456_s10 }
  0x68   : > { %s673_s10 = smov %s460_s11  ;;  %s674_s11 = smov %s559_s28 }
  0x69   : > { %s675_s12 = smov %s532_s20  ;;  %18 = sbr.rel (!%p16_p0) target bundleno = 6 (0x6), region = 77 }
  0x6e   :  { %209 = vsyncpa [#allocation3], 1 }
  0x6f   :  { %211 = vsyncpa [#allocation3 + $0x1], 1 }
  0x70   :  { %212 = vsyncpa [#allocation6], 1 }
  0x71   :  { %213 = vsyncpa [#allocation4], 1 }
  0x72   :  { %215 = vsyncpa [#allocation4 + $0x1], 1 }

</bundles_post_ra>
